<compile_context>
chip_gen: v6e
topology: v6e:2x2x1
jax: 0.10.0
libtpu: 0.0.40
codegen_flags: <defaults>
</compile_context>

<pallas_src>
import jax
import jax.numpy as jnp
from jax.experimental import pallas as pl
from jax.experimental.pallas import tpu as pltpu


_LANE = 128
# Budget for the double-buffered (C, THW) input + output tiles:
#   2 arrays * 2 buffers * C * THW * itemsize <= _TILE_VMEM_BUDGET
# Comfortably under scoped-VMEM defaults (16 MiB v5e / 32 MiB v6e, v7x) and
# under the physical 64 MiB per-TC VMEM on v7x.
_TILE_VMEM_BUDGET = 8 * 1024 * 1024
# Scoped-VMEM limit requested from the compiler (tiles + weight + headroom).
_VMEM_LIMIT_BYTES = 24 * 1024 * 1024


# ----------------------------- Pallas kernel -------------------------------

def conv1x1_kernel(w_ref, x_ref, y_ref):
    # w: (C, C) resident across the whole grid; x/y tile: (C, THW), lanes = spatial.
    # jnp.dot hits the MXU; at tiny C the op is DMA-bound so MXU vs. VPU
    # broadcast is a wash -- keep dot so it scales to larger channel counts.
    y_ref[...] = jnp.dot(
        w_ref[...], x_ref[...], preferred_element_type=jnp.float32
    ).astype(y_ref.dtype)


# ------------------------------- Wrapper ------------------------------------

def _pick_thw(hw, c, itemsize):
    """Largest lane tile: 128-multiple capped by the VMEM budget, or full H*W."""
    cap = _TILE_VMEM_BUDGET // (2 * 2 * c * itemsize)  # elements along the lane axis
    cap = max(_LANE, (cap // _LANE) * _LANE)           # keep it 128-aligned
    return hw if hw <= cap else cap


def invertible_conv2d_1x1(x, logdet, weight):
    """x: (N, C, H, W) float32, logdet: (N,) float32, weight: (C, C) float32."""
    N, C, H, W = x.shape
    HW = H * W

    # Free view: NCHW is contiguous, so (N, C, H*W) is a metadata-only reshape.
    x3 = x.reshape(N, C, HW)

    THW = _pick_thw(HW, C, x.dtype.itemsize)
    grid = (N, pl.cdiv(HW, THW))

    itemsize = x.dtype.itemsize
    cost = pl.CostEstimate(
        flops=2 * C * C * N * HW,
        transcendentals=0,
        bytes_accessed=(C * C + 2 * N * C * HW) * itemsize,
    )

    y3 = pl.pallas_call(
        conv1x1_kernel,
        out_shape=jax.ShapeDtypeStruct((N, C, HW), x.dtype),
        grid_spec=pltpu.PrefetchScalarGridSpec(
            num_scalar_prefetch=0,
            grid=grid,
            in_specs=[
                pl.BlockSpec((C, C), lambda n, t: (0, 0)),             # weight, resident
                pl.BlockSpec((None, C, THW), lambda n, t: (n, 0, t)),  # x slab tile
            ],
            out_specs=pl.BlockSpec((None, C, THW), lambda n, t: (n, 0, t)),
        ),
        compiler_params=pltpu.CompilerParams(
            dimension_semantics=("parallel", "parallel"),
            vmem_limit_bytes=_VMEM_LIMIT_BYTES,
        ),
        cost_estimate=cost,
    )(weight, x3)

    y = y3.reshape(N, C, H, W)

    # log|det(W)| on the tiny (C, C) parameter stays in plain JAX, and the
    # (N,)-sized logdet add is free inside XLA (no separate micro pallas_call).
    # TODO(synk): det/LU of the CxC weight has no clean Pallas equivalent.
    _, logabsdet = jnp.linalg.slogdet(weight.astype(jnp.float32))
    logdet_out = logdet + (H * W) * logabsdet.astype(logdet.dtype)

    return y, logdet_out


# --------------------------------- Main --------------------------------------

if __name__ == "__main__":
    key = jax.random.PRNGKey(0)
    k_w, k_x, k_ld = jax.random.split(key, 3)

    N, C, H, W = 2, 4, 16, 16

    # Deterministic init mirroring the module: orthogonal weight from QR.
    w_raw = jax.random.normal(k_w, (C, C), dtype=jnp.float32)
    weight, _ = jnp.linalg.qr(w_raw)
    weight = weight.astype(jnp.float32)

    x = jax.random.normal(k_x, (N, C, H, W), dtype=jnp.float32)
    logdet = jax.random.normal(k_ld, (N,), dtype=jnp.float32)

    y, logdet_out = invertible_conv2d_1x1(x, logdet, weight)
    y = jax.block_until_ready(y)
    logdet_out = jax.block_until_ready(logdet_out)

    # Sanity check against a plain-JAX reference of the same math.
    y_ref = jnp.einsum("oi,nihw->nohw", weight, x)
    _, lad = jnp.linalg.slogdet(weight)
    ld_ref = logdet + H * W * lad
    assert jnp.allclose(y, y_ref, atol=1e-5, rtol=1e-5)
    assert jnp.allclose(logdet_out, ld_ref, atol=1e-5, rtol=1e-5)
    assert y.shape == (N, C, H, W) and logdet_out.shape == (N,)

    print("KERNEL_OK")
</pallas_src>

<mosaic_0001>
module attributes {stable_mosaic.version = 11 : i64} {
  func.func @conv1x1_kernel(%arg0: i32, %arg1: i32, %arg2: memref<4x4xf32, #tpu.memory_space<vmem>>, %arg3: memref<1x4x256xf32, #tpu.memory_space<vmem>>, %arg4: memref<1x4x256xf32, #tpu.memory_space<vmem>>) attributes {dimension_semantics = [#tpu.dimension_semantics<parallel>, #tpu.dimension_semantics<parallel>], iteration_bounds = array<i64: 2, 1>, scalar_prefetch = 0 : i64, scratch_operands = 0 : i64, tpu.core_type = #tpu.core_type<tc>, window_params = [{pipeline_mode = #tpu.pipeline_mode<synchronous>, transform_indices = @transform_0, window_bounds = array<i64: 4, 4>}, {transform_indices = @transform_1, window_bounds = array<i64: 1, 4, 256>}, {transform_indices = @transform_2, window_bounds = array<i64: 1, 4, 256>}]} {
    %c0 = arith.constant 0 : index
    %c0_0 = arith.constant 0 : index
    %0 = vector.load %arg2[%c0, %c0_0] : memref<4x4xf32, #tpu.memory_space<vmem>>, vector<4x4xf32>
    %c0_1 = arith.constant 0 : index
    %c0_2 = arith.constant 0 : index
    %c0_3 = arith.constant 0 : index
    %1 = vector.load %arg3[%c0_1, %c0_2, %c0_3] : memref<1x4x256xf32, #tpu.memory_space<vmem>>, vector<1x4x256xf32>
    %2 = vector.shape_cast %1 : vector<1x4x256xf32> to vector<4x256xf32>
    %cst = arith.constant dense<0.000000e+00> : vector<4x256xf32>
    %3 = tpu.matmul %0, %2, %cst {dimension_numbers = #tpu.dot_dimension_numbers<[1], [0], [0], [1], [0, 0, 1, 1], [], []>} : vector<4x4xf32>, vector<4x256xf32>, vector<4x256xf32> -> vector<4x256xf32>
    %c0_4 = arith.constant 0 : index
    %c0_5 = arith.constant 0 : index
    %c0_6 = arith.constant 0 : index
    %4 = vector.load %arg4[%c0_4, %c0_5, %c0_6] : memref<1x4x256xf32, #tpu.memory_space<vmem>>, vector<1x4x256xf32>
    %5 = vector.shape_cast %4 : vector<1x4x256xf32> to vector<4x256xf32>
    %6 = vector.shape_cast %3 : vector<4x256xf32> to vector<1x4x256xf32>
    tpu.vector_store %arg4[%c0_4, %c0_5, %c0_6], %6 {strides = array<i32>} : memref<1x4x256xf32, #tpu.memory_space<vmem>>, vector<1x4x256xf32>,
    return
  }
  func.func @transform_0(%arg0: i32, %arg1: i32) -> (i32, i32) {
    %c0_i32 = arith.constant 0 : i32
    %c0_i32_0 = arith.constant 0 : i32
    %c0_i32_1 = arith.constant 0 : i32
    return %c0_i32, %c0_i32_0 : i32, i32
  }
  func.func @transform_1(%arg0: i32, %arg1: i32) -> (i32, i32, i32) {
    %c0_i32 = arith.constant 0 : i32
    %c0_i32_0 = arith.constant 0 : i32
    return %arg0, %c0_i32, %arg1 : i32, i32, i32
  }
  func.func @transform_2(%arg0: i32, %arg1: i32) -> (i32, i32, i32) {
    %c0_i32 = arith.constant 0 : i32
    %c0_i32_0 = arith.constant 0 : i32
    return %arg0, %c0_i32, %arg1 : i32, i32, i32
  }
}

</mosaic_0001>

<bundles_post_ra>
// kernel: tpu_custom_call.1
= control target key start
LH: loop header
LB: loop body
LE: loop exit
PB: predicated region body
PF: predicated region fallthrough
CT: control target
= control target key end

     0   :  { %7 = vsyncpa [#allocation3], 0  ;;  %s812_s0 = inlined_call_operand.hbm [shape: f32[4,4], index: 0, kind: input, shape index: {}]   ;;  %s813_s1 = inlined_call_operand.hbm [shape: f32[2,4,256], index: 1, kind: input, shape index: {}]   ;;  %s814_s2 = inlined_call_operand.hbm [shape: f32[2,4,256], index: 2, kind: output, shape index: {}]  }
   0x1   :  { %8 = vsyncpa [#allocation6], 0 }
   0x2   :  { %10 = vsyncpa [#allocation6 + $0x1], 0 }
   0x3   :  { %11 = vsyncpa [#allocation4], 0 }
   0x4   :  { %13 = vsyncpa [#allocation4 + $0x1], 0  ;;  %s651_s9 = smov 0   ;;  %s653_s10 = smov 0  }
   0x5   :  { %s655_s11 = smov 0   ;;  %s657_s12 = smov 0  }
   0x6   :  { %s659_s13 = smov 0   ;;  %s661_s14 = smov 0  }
   0x7 LB: > { %s395_s15 = sadd.s32 4294967295, %s630_s14   ;;  %s396_s16 = sadd.s32 4294967294, %s630_s14   ;;  %s630_s14 = sphi %s661_s14, %s19_s14   ;;  %s626_s13 = sphi %s659_s13, %s831_s13   ;;  %s622_s12 = sphi %s657_s12, %s830_s12   ;;  %s618_s11 = sphi %s655_s11, %s829_s11   ;;  %s614_s10 = sphi %s653_s10, %s828_s10   ;;  %s610_s9 = sphi %s651_s9, %s827_s9  }
   0x8   : > { %p74_p0 = scmp.ne.s32.totalorder %s614_s10, %s610_s9  ;;  %p685_p1 = scmp.eq.s32.totalorder %s395_s15, 0 }
   0x9   : > { %p689_p2 = scmp.eq.s32.totalorder %s395_s15, 1  ;;  %p106_p3 = scmp.eq.s32.totalorder %s396_s16, 1 }
   0xa   : > { %p695_p4 = por %p685_p1, %p74_p0  ;;  %p397_p5 = scmp.ge.s32.totalorder %s630_s14, 1 }
   0xb   : > { %p700_p6 = por %p106_p3, %p74_p0  ;;  %p113_p7 = scmp.lt.s32.totalorder %s630_s14, 3 }
   0xc   : > { %s818_s19 = scalar_select %p695_p4, 1, 0 }
   0xd   : > { %s819_s20 = scalar_select %p700_p6, 1, 0 }
   0xe   : > { %p705_p8 = pnand %p397_p5, %p113_p7  ;;  %s632_s22 = smov [#allocation2]  }
   0xf   : > { %s126_s23 = sshll.u32 %s632_s22, 4  ;;  %s31_s25 = sadd.s32 1, %s626_s13  ;;  %s127_s23 = int_to_ptr.vmem [resolvable:$true] %s126_s23 }
  0x10   : > { %p425_p10 = pneg %p705_p8  ;;  %s61_s26 = sadd.s32 1, %s618_s11 }
  0x11   : > { %p33_p12 = scmp.ge.s32.totalorder %s31_s25, 2  ;;  %s503_s27 = scalar_lea.vmem %s127_s23, 64 }
  0x12   : > { %p714_p11 = pnand %p425_p10, %p685_p1  ;;  %p504_p0 = scmp.ne.s32.totalorder %s127_s23, %s503_s27 }
  0x13   : > { %p511_p7 = scmp.lt.s32.totalorder %s127_s23, %s127_s23  ;;  %p512_p6 = scmp.lt.s32.totalorder %s503_s27, %s503_s27 }
  0x14   : > { %p494_p13 = pneg %p714_p11 }
  0x15   : > { %p513_p9 = por %p512_p6, %p511_p7 }
  0x16   : > { %p506_p3 = pnand %p504_p0, %p494_p13 }
  0x18   : > { %p507_p5 = pneg %p506_p3 }
  0x1a   : > { %p514_p4 = pnand %p513_p9, %p507_p5 }
  0x1c   : > { %517 = shalt.err (!%p514_p4)
}
  0x1d   : > { %428 = dma.hbm_to_vmem [thread:$0]  (!%p714_p11), %s812_s0, 64, %s127_s23, [#allocation3]  }
  0x1e   : > { %s833_s25 = smov (%p33_p12, %s31_s25), 0  ;;  %p68_p6 = scmp.ne.s32.totalorder %s618_s11, %s614_s10 }
  0x1f   : > { %p69_p4 = scmp.eq.s32.totalorder %s630_s14, 0  ;;  %s56_s30 = ssub.s32 %s626_s13, %s833_s25 }
  0x20   : > { %p438_p9 = scmp.lt.s32.totalorder %s630_s14, 2  ;;  %p59_p10 = scmp.eq.s32.totalorder %s56_s30, 0 }
  0x21   : > { %p70_p13 = por %p69_p4, %p68_p6  ;;  %p737_p0 = por %p689_p2, %p68_p6 }
  0x22   : > { %s137_s4 = sand.u32 1, %s618_s11   ;;  %s415_s7 = sshll.u32 %s626_s13, 7 }
  0x23   : > { %s743_s5 = scalar_select %p59_p10, %s618_s11, %s61_s26  }
  0x24   : > { %s400_s6 = sshll.u32 %s137_s4, 3  ;;  %s149_s16 = scalar_lea.hbm %s813_s1, %s415_s7 }
  0x25   : > { %s141_s22 = scalar_lea.vmem [#allocation5], %s400_s6  ;;  %p749_p11 = pnand %p438_p9, %p70_p13 }
  0x26   : > { %s151_s23 = sshll.u32 %s141_s22, 4  ;;  %s138_s18 = scalar_lea.sflag [#allocation6], %s137_s4  ;;  %s152_s23 = int_to_ptr.vmem [resolvable:$true] %s151_s23 }
  0x27   : > { %p520_p2 = pneg %p749_p11  ;;  %s531_s27 = scalar_lea.vmem %s152_s23, 128 }
  0x28   : > { %p532_p12 = scmp.ne.s32.totalorder %s152_s23, %s531_s27  ;;  %s633_s26 = smov [#allocation5]  }
  0x29   : > { %s536_s28 = sshll.u32 %s633_s26, 4  ;;  %s537_s28 = int_to_ptr.vmem [resolvable:$false] %s536_s28 }
  0x2a   : > { %p534_p3 = pnand %p532_p12, %p520_p2  ;;  %s538_s29 = scalar_lea.vmem %s537_s28, 256 }
  0x2b   : > { %p539_p7 = scmp.lt.s32.totalorder %s152_s23, %s537_s28  ;;  %p540_p6 = scmp.lt.s32.totalorder %s538_s29, %s531_s27 }
  0x2c   : > { %p535_p5 = pneg %p534_p3 }
  0x2d   : > { %p541_p4 = por %p540_p6, %p539_p7 }
  0x2f   : > { %p542_p10 = pnand %p541_p4, %p535_p5 }
  0x31   : > { %545 = shalt.err (!%p542_p10)
}
  0x32   : > { %432 = dma.hbm_to_vmem [thread:$0]  (!%p749_p11), %s149_s16, 128, %s152_s23, %s138_s18  }
  0x33   : > { %160 = sbr.rel (%p705_p8) target bundleno = 276 (0x114), region = 28 }
  0x38   : > { %597 = dma.done.wait (%p685_p1), [#allocation3], 64  }
  0x39   : > { %599 = vsyncadd (%p685_p1), [#allocation3], 4294967232  ;;  %s764_s30 = sand.u32 1, %s614_s10   ;;  %p824_p9 = scmp.ne.s32.totalorder %s818_s19, 0 }
  0x3a   : > { %s405_s4 = sshll.u32 %s764_s30, 3  ;;  %s167_s6 = scalar_lea.sflag [#allocation6], %s764_s30 }
  0x3b   : > { %s170_s7 = scalar_lea.vmem [#allocation5], %s405_s4 }
  0x3c   : > { %601 = dma.done.wait (%p824_p9), %s167_s6, 128  }
  0x3d   : > { %603 = vsyncadd (%p824_p9), %s167_s6, 4294967168  ;;  %v634_v0 = vmov 0.0   ;;  %v194_v1 = vld [vmem:[%s170_s7] sm:$0xff]  ;;  %vm201_vm0 = vcmask 1043456   ;;  %v193_v3 = vld [vmem:[#allocation2] sm:$0xf] }
  0x3e   : > { %270 = vmatprep.mubr.f32.mxu0 %v634_v0  ;;  %v196_v2 = vcombine.high %v194_v1, %v194_v1  ;;  %vm197_vm1 = vcmask 31744   ;;  %s416_s17 = sshll.u32 %s622_s12, 7  ;;  %s190_s21 = scalar_lea.vmem [#allocation7], %s405_s4 }
  0x3f   : > { %s299_s8 = sshll.u32 %s190_s21, 4  ;;  %s297_s16 = scalar_lea.hbm %s814_s2, %s416_s17  ;;  %s300_s8 = int_to_ptr.vmem [resolvable:$true] %s299_s8 }
  0x40   : > { %407 = vmatprep.subr.msk.mxu0 %vm201_vm0, %v196_v2  ;;  %s283_s22 = scalar_lea.sflag [#allocation4], %s764_s30  ;;  %s546_s23 = scalar_lea.vmem %s300_s8, 128 }
  0x41   : > { %408 = vmatpush1.msk.msra.mxu0 %vm201_vm0, %v194_v1  ;;  %p547_p1 = scmp.ne.s32.totalorder %s300_s8, %s546_s23  ;;  %s635_s24 = smov [#allocation7]  }
  0x42   : > { %409 = vmatmul.mubr.msk.f32.vlgmr.msra.gmra.mxu0 %vm197_vm1, %v193_v3  ;;  %s550_s18 = sshll.u32 %s635_s24, 4  ;;  %s551_s18 = int_to_ptr.vmem [resolvable:$false] %s550_s18 }
  0x43   : > { %p548_p8 = pnand %p547_p1, %p737_p0  ;;  %s552_s12 = scalar_lea.vmem %s551_s18, 256 }
  0x44   : > { %p553_p11 = scmp.lt.s32.totalorder %s300_s8, %s551_s18  ;;  %p554_p2 = scmp.lt.s32.totalorder %s552_s12, %s546_s23 }
  0x45   : > { %p549_p13 = pneg %p548_p8 }
  0x46   : > { %p555_p12 = por %p554_p2, %p553_p11 }
  0x48   : > { %p556_p3 = pnand %p555_p12, %p549_p13 }
 0x102   : > { %v272_v4 = vpop.f32.mrf.mxu0 }
 0x104   : > { %v274_v5 = vpop.f32.mrf.mxu0 }
 0x105   : > { %v279_v6 = vcombine.low %v272_v4, %v274_v5 }
 0x107   : > { %281 = vst [vmem:[%s190_s21] sm:$0xff] %v279_v6 }
 0x108   : > { %559 = shalt.err (!%p556_p3)
}
 0x109   : > { %s560_s27 = scalar_lea.hbm %s297_s16, 128  ;;  %s564_s29 = scalar_lea.hbm %s814_s2, 256 }
 0x10a   : > { %p561_p5 = scmp.ne.s32.totalorder %s297_s16, %s560_s27  ;;  %p565_p4 = scmp.lt.s32.totalorder %s297_s16, %s814_s2 }
 0x10b   : > { %p566_p10 = scmp.lt.s32.totalorder %s564_s29, %s560_s27 }
 0x10c   : > { %p562_p7 = pnand %p561_p5, %p737_p0 }
 0x10d   : > { %p567_p9 = por %p566_p10, %p565_p4 }
 0x10e   : > { %p563_p6 = pneg %p562_p7 }
 0x110   : > { %p568_p1 = pnand %p567_p9, %p563_p6 }
 0x112   : > { %571 = shalt.err (!%p568_p1)
}
 0x113   : > { %423 = dma.vmem_to_hbm [thread:$0]  (%p737_p0), %s300_s8, 128, %s297_s16, %s283_s22  }
 0x114 PF: > { %s311_s6 = sand.u32 1, %s610_s9   ;;  %p825_p8 = scmp.ne.s32.totalorder %s819_s20, 0 }
 0x115   : > { %p826_p13 = scmp.ge.s32.totalorder %s630_s14, 2  ;;  %s312_s7 = scalar_lea.sflag [#allocation4], %s311_s6 }
 0x117   : > { %p434_p11 = pnand %p826_p13, %p825_p8 }
 0x119   : > { %p435_p2 = pneg %p434_p11 }
 0x11b   : > { %605 = dma.done.wait (%p435_p2), %s312_s7, 128  }
 0x11c   : > { %607 = vsyncadd (%p435_p2), %s312_s7, 4294967168  ;;  %s19_s14 = sadd.s32 1, %s630_s14   ;;  %s827_s9 = smov %s614_s10 }
 0x11d   : > { %p16_p12 = scmp.ge.s32.totalorder %s19_s14, 4   ;;  %s828_s10 = smov %s618_s11 }
 0x11e   : > { %s829_s11 = smov %s743_s5  ;;  %s830_s12 = smov %s626_s13 }
 0x11f   : > { %s831_s13 = smov %s833_s25  ;;  %18 = sbr.rel (!%p16_p12) target bundleno = 7 (0x7), region = 78 }
 0x124   :  { %317 = vsyncpa [#allocation3], 1 }
 0x125   :  { %319 = vsyncpa [#allocation3 + $0x1], 1 }
 0x126   :  { %320 = vsyncpa [#allocation6], 1 }
 0x127   :  { %322 = vsyncpa [#allocation6 + $0x1], 1 }
 0x128   :  { %323 = vsyncpa [#allocation4], 1 }
 0x129   :  { %325 = vsyncpa [#allocation4 + $0x1], 1 }

</bundles_post_ra>
